<compile_context>
chip_gen: v5e
topology: v5e:2x2
jax: 0.10.0
libtpu: 0.0.40
codegen_flags: <defaults>
</compile_context>

<pallas_src>
import jax
import jax.numpy as jnp
import numpy as np
from jax.experimental import pallas as pl
from jax.experimental.pallas import tpu as pltpu  # noqa: F401 (TPU backend)

# ---------------- configuration (small, consistent with the module) ----------
D_MODEL = 32
NUM_HEADS = 1
EXPAND_RATIO = 3
RPE_EMBEDDING = 64
RPE_LAYERS = 3
GAMMA = 0.99

B = 2
N = 8  # sequence length

D1 = (int(EXPAND_RATIO * D_MODEL) // NUM_HEADS) * NUM_HEADS
HEAD_DIM = D1 // NUM_HEADS
D1_PAD = ((D1 + 127) // 128) * 128  # lane-tile aligned offset of the v block


# ---------------- RPE coefficient generation (plain-JAX parameter setup) -----
def simple_rms_norm(x, eps=1e-8):
    d = x.shape[-1]
    norm = jnp.linalg.norm(x, axis=-1, keepdims=True)
    rms = norm * (d ** -0.5)
    return x / (rms + eps)


def rpe_forward(pos, rpe):
    # pos: (m, 1) -> (m, NUM_HEADS * HEAD_DIM); non-residual, relu, simplermsnorm
    x = pos @ rpe["pos_proj_w"] + rpe["pos_proj_b"]
    for l in range(RPE_LAYERS):
        h = jax.nn.relu(simple_rms_norm(x))
        x = h @ rpe[f"layer{l}_w"] + rpe[f"layer{l}_b"]
    h = jax.nn.relu(simple_rms_norm(x))
    return h @ rpe["out_w"] + rpe["out_b"]


def rpe_transform(pos, rpe):
    res = rpe_forward(pos, rpe)                       # (m, h*d)
    m = res.shape[0]
    res = res.reshape(m, NUM_HEADS, HEAD_DIM)         # 'n (h d) -> h n d'
    return jnp.transpose(res, (1, 0, 2))


def build_toeplitz(rpe, n):
    """Build T[h, i, j, d] = a[h, (i-j) mod 2n, d] — the non-causal Tno
    coefficients with par_type=1 and fixed-gamma decay (use_decay=True)."""
    zero_idx = jnp.zeros((1, 1), jnp.float32)
    pos_idx = jnp.arange(1, n, dtype=jnp.float32).reshape(n - 1, 1)
    neg_idx = (-jnp.arange(1, n, dtype=jnp.float32)[::-1]).reshape(n - 1, 1)

    zero_c = rpe_transform(zero_idx, rpe)             # (h, 1,   d)
    pos_c = rpe_transform(pos_idx, rpe)               # (h, n-1, d)
    neg_c = rpe_transform(neg_idx, rpe)               # (h, n-1, d)

    coef = jnp.arange(1, n, dtype=jnp.float32).reshape(1, n - 1, 1)
    gamma = jnp.full((NUM_HEADS, 1, HEAD_DIM), GAMMA, jnp.float32) ** coef
    pos_c = gamma * pos_c
    neg_c = jnp.flip(gamma, axis=1) * neg_c

    a = jnp.concatenate([zero_c, pos_c, zero_c, neg_c], axis=1)  # (h, 2n, d)
    # act_type='none' -> identity

    idx = (jnp.arange(n)[:, None] - jnp.arange(n)[None, :]) % (2 * n)  # (n, n)
    return a[:, idx, :]                                # (h, n, n, d)


# ---------------- Pallas kernel: whole hot path, single invocation ------------
def gtu_kernel(x_ref, wuv_ref, buv_ref, wo_ref, bo_ref, t_ref, o_ref):
    n = t_ref.shape[0]
    rows = x_ref.shape[0]          # B * N
    bsz = rows // n

    x = x_ref[...]                                              # (B*N, D)

    # Fused u|v projection: one MXU pass.  Column layout of wuv/buv is
    # [Wu (D1) | zero pad to D1_PAD | Wv (D1)] -> both slices below start on a
    # 128-lane-tile boundary, so no cross-lane relayout is needed.
    uv = jnp.dot(x, wuv_ref[...],
                 preferred_element_type=jnp.float32) + buv_ref[...]
    uv = uv * jax.nn.sigmoid(uv)                                # silu
    u = uv[:, :D1]                                              # (B*N, D1)
    v = uv[:, D1_PAD:D1_PAD + D1]                               # (B*N, D1)

    # Per-channel Toeplitz mixing over the sequence axis (heads already folded
    # into the channel axis of t_ref):
    #   mix[b*n + i, c] = sum_j T[i, j, c] * v[b*n + j, c]
    # Channels (D1) sit on lanes; the j reduction runs over sublanes.
    t = t_ref[...]                                              # (n, n, D1)
    vb = v.reshape(bsz, 1, n, D1)                               # (B, 1, n, D1)
    mix = jnp.sum(t[None, :, :, :] * vb, axis=2)                # (B, n, D1)
    mix = mix.reshape(rows, D1)                                 # (B*N, D1)

    gated = u * mix                                             # (B*N, D1)
    out = jnp.dot(gated, wo_ref[...],
                  preferred_element_type=jnp.float32) + bo_ref[...]
    # NOTE: last dim is D_MODEL=32 (<128 lanes) -> masked store; lane-dense
    # repacking only pays off once B*N*D is large, so keep the natural layout.
    o_ref[...] = out.astype(o_ref.dtype)


def gtu_forward(x, params):
    """Gtu.forward(x) -> (output, None)."""
    bsz, n, d = x.shape

    # ---- parameter setup (plain JAX, once per call) ----
    t = build_toeplitz(params["rpe"], n)                         # (h, n, n, hd)
    # fold heads into the channel axis: c = h*HEAD_DIM + hd  (matches v layout)
    t_flat = jnp.transpose(t, (1, 2, 0, 3)).reshape(n, n, D1)    # (n, n, D1)

    pad = D1_PAD - D1
    wuv = jnp.concatenate(
        [params["wu"], jnp.zeros((d, pad), jnp.float32), params["wv"]], axis=1)
    buv = jnp.concatenate(
        [params["bu"], jnp.zeros((1, pad), jnp.float32), params["bv"]], axis=1)

    x2 = x.reshape(bsz * n, d)

    # Single invocation, no grid: batch folded into the matmul M dimension.
    # All operands (<100 KiB total) live in VMEM for the whole kernel.
    out = pl.pallas_call(
        gtu_kernel,
        out_shape=jax.ShapeDtypeStruct((bsz * n, d), jnp.float32),
    )(x2, wuv, buv, params["wo"], params["bo"], t_flat)

    # TODO(synk): for large n, tile the i (and j) axes of the Toeplitz tensor
    # with a grid — T is O(n^2 * D1) bytes and would exhaust VMEM (especially
    # the 64 MiB on v7x) if kept fully resident.
    return out.reshape(bsz, n, d), None


# ---------------- pure-JAX reference (same math, for a sanity check) ----------
def gtu_reference(x, params):
    bsz, n, _ = x.shape
    t = build_toeplitz(params["rpe"], n)
    u = jax.nn.silu(x @ params["wu"] + params["bu"])
    v = jax.nn.silu(x @ params["wv"] + params["bv"])
    vh = v.reshape(bsz, n, NUM_HEADS, HEAD_DIM).transpose(0, 2, 1, 3)
    mix = jnp.einsum("hijd,bhjd->bhid", t, vh)
    mix = mix.transpose(0, 2, 1, 3).reshape(bsz, n, D1)
    return (u * mix) @ params["wo"] + params["bo"]


# ---------------- deterministic parameter init --------------------------------
def init_params(key):
    keys = jax.random.split(key, 8 + 2 * RPE_LAYERS + 4)
    k = iter(keys)
    s = 0.1
    rpe = {
        "pos_proj_w": jax.random.normal(next(k), (1, RPE_EMBEDDING), jnp.float32) * s,
        "pos_proj_b": jax.random.normal(next(k), (RPE_EMBEDDING,), jnp.float32) * s,
        "out_w": jax.random.normal(next(k), (RPE_EMBEDDING, NUM_HEADS * HEAD_DIM),
                                   jnp.float32) * s,
        "out_b": jax.random.normal(next(k), (NUM_HEADS * HEAD_DIM,), jnp.float32) * s,
    }
    for l in range(RPE_LAYERS):
        rpe[f"layer{l}_w"] = jax.random.normal(
            next(k), (RPE_EMBEDDING, RPE_EMBEDDING), jnp.float32) * s
        rpe[f"layer{l}_b"] = jax.random.normal(
            next(k), (RPE_EMBEDDING,), jnp.float32) * s
    params = {
        "wu": jax.random.normal(next(k), (D_MODEL, D1), jnp.float32) * s,
        "bu": jax.random.normal(next(k), (1, D1), jnp.float32) * s,
        "wv": jax.random.normal(next(k), (D_MODEL, D1), jnp.float32) * s,
        "bv": jax.random.normal(next(k), (1, D1), jnp.float32) * s,
        "wo": jax.random.normal(next(k), (D1, D_MODEL), jnp.float32) * s,
        "bo": jax.random.normal(next(k), (1, D_MODEL), jnp.float32) * s,
        "rpe": rpe,
    }
    return params


if __name__ == "__main__":
    key = jax.random.PRNGKey(0)
    pkey, xkey = jax.random.split(key)
    params = init_params(pkey)
    x = jax.random.normal(xkey, (B, N, D_MODEL), jnp.float32)

    out, state = gtu_forward(x, params)
    out = jax.block_until_ready(out)

    ref = gtu_reference(x, params)
    np.testing.assert_allclose(np.asarray(out), np.asarray(ref),
                               rtol=1e-4, atol=1e-4)
    assert out.shape == (B, N, D_MODEL) and state is None
    print("KERNEL_OK")
</pallas_src>

<mosaic_0001>
module attributes {stable_mosaic.version = 11 : i64} {
  func.func @gtu_kernel(%arg0: memref<16x32xf32, #tpu.memory_space<vmem>>, %arg1: memref<32x224xf32, #tpu.memory_space<vmem>>, %arg2: memref<1x224xf32, #tpu.memory_space<vmem>>, %arg3: memref<96x32xf32, #tpu.memory_space<vmem>>, %arg4: memref<1x32xf32, #tpu.memory_space<vmem>>, %arg5: memref<8x8x96xf32, #tpu.memory_space<vmem>>, %arg6: memref<16x32xf32, #tpu.memory_space<vmem>>) attributes {dimension_semantics = [], scalar_prefetch = 0 : i64, scratch_operands = 0 : i64, tpu.core_type = #tpu.core_type<tc>} {
    %c0 = arith.constant 0 : index
    %c0_0 = arith.constant 0 : index
    %0 = vector.load %arg0[%c0, %c0_0] : memref<16x32xf32, #tpu.memory_space<vmem>>, vector<16x32xf32>
    %c0_1 = arith.constant 0 : index
    %c0_2 = arith.constant 0 : index
    %1 = vector.load %arg1[%c0_1, %c0_2] : memref<32x224xf32, #tpu.memory_space<vmem>>, vector<32x224xf32>
    %cst = arith.constant dense<0.000000e+00> : vector<16x224xf32>
    %2 = tpu.matmul %0, %1, %cst {dimension_numbers = #tpu.dot_dimension_numbers<[1], [0], [0], [1], [0, 0, 1, 1], [], []>} : vector<16x32xf32>, vector<32x224xf32>, vector<16x224xf32> -> vector<16x224xf32>
    %c0_3 = arith.constant 0 : index
    %c0_4 = arith.constant 0 : index
    %3 = vector.load %arg2[%c0_3, %c0_4] : memref<1x224xf32, #tpu.memory_space<vmem>>, vector<1x224xf32>
    %4 = vector.broadcast %3 : vector<1x224xf32> to vector<16x224xf32>
    %5 = arith.addf %2, %4 : vector<16x224xf32>
    %6 = arith.negf %5 : vector<16x224xf32>
    %7 = math.exp %6 : vector<16x224xf32>
    %cst_5 = arith.constant 1.000000e+00 : f32
    %8 = vector.broadcast %cst_5 : f32 to vector<16x224xf32>
    %9 = arith.addf %8, %7 : vector<16x224xf32>
    %10 = arith.divf %8, %9 : vector<16x224xf32>
    %11 = arith.mulf %5, %10 : vector<16x224xf32>
    %12 = vector.extract_strided_slice %11 {offsets = [0, 0], sizes = [16, 96], strides = [1, 1]} : vector<16x224xf32> to vector<16x96xf32>
    %13 = vector.extract_strided_slice %11 {offsets = [0, 128], sizes = [16, 96], strides = [1, 1]} : vector<16x224xf32> to vector<16x96xf32>
    %c0_6 = arith.constant 0 : index
    %c0_7 = arith.constant 0 : index
    %c0_8 = arith.constant 0 : index
    %14 = vector.load %arg5[%c0_6, %c0_7, %c0_8] : memref<8x8x96xf32, #tpu.memory_space<vmem>>, vector<8x8x96xf32>
    %15 = vector.shape_cast %13 : vector<16x96xf32> to vector<2x1x8x96xf32>
    %16 = vector.shape_cast %14 : vector<8x8x96xf32> to vector<1x8x8x96xf32>
    %17 = vector.broadcast %16 : vector<1x8x8x96xf32> to vector<2x8x8x96xf32>
    %18 = vector.broadcast %15 : vector<2x1x8x96xf32> to vector<2x8x8x96xf32>
    %19 = arith.mulf %17, %18 : vector<2x8x8x96xf32>
    %cst_9 = arith.constant dense<0.000000e+00> : vector<2x8x96xf32>
    %20 = vector.multi_reduction <add>, %19, %cst_9 [2] : vector<2x8x8x96xf32> to vector<2x8x96xf32>
    %21 = vector.shape_cast %20 : vector<2x8x96xf32> to vector<16x96xf32>
    %22 = arith.mulf %12, %21 : vector<16x96xf32>
    %c0_10 = arith.constant 0 : index
    %c0_11 = arith.constant 0 : index
    %23 = vector.load %arg3[%c0_10, %c0_11] : memref<96x32xf32, #tpu.memory_space<vmem>>, vector<96x32xf32>
    %cst_12 = arith.constant dense<0.000000e+00> : vector<16x32xf32>
    %24 = tpu.matmul %22, %23, %cst_12 {dimension_numbers = #tpu.dot_dimension_numbers<[1], [0], [0], [1], [0, 0, 1, 1], [], []>} : vector<16x96xf32>, vector<96x32xf32>, vector<16x32xf32> -> vector<16x32xf32>
    %c0_13 = arith.constant 0 : index
    %c0_14 = arith.constant 0 : index
    %25 = vector.load %arg4[%c0_13, %c0_14] : memref<1x32xf32, #tpu.memory_space<vmem>>, vector<1x32xf32>
    %26 = vector.broadcast %25 : vector<1x32xf32> to vector<16x32xf32>
    %27 = arith.addf %24, %26 : vector<16x32xf32>
    %c0_15 = arith.constant 0 : index
    %c0_16 = arith.constant 0 : index
    %28 = vector.load %arg6[%c0_15, %c0_16] : memref<16x32xf32, #tpu.memory_space<vmem>>, vector<16x32xf32>
    tpu.vector_store %arg6[%c0_15, %c0_16], %27 {strides = array<i32>} : memref<16x32xf32, #tpu.memory_space<vmem>>, vector<16x32xf32>,
    return
  }
}

</mosaic_0001>

<bundles_post_ra>
// kernel: tpu_custom_call.1
= control target key start
LH: loop header
LB: loop body
LE: loop exit
PB: predicated region body
PF: predicated region fallthrough
CT: control target
= control target key end

     0   :  { %11 = vsyncpa [#allocation3], 0  ;;  %s873_s0 = inlined_call_operand.hbm [shape: f32[16,32], index: 0, kind: input, shape index: {}]   ;;  %s874_s1 = inlined_call_operand.vmem [shape: f32[32,224], index: 1, kind: input, shape index: {}]   ;;  %s875_s2 = inlined_call_operand.hbm [shape: f32[1,224], index: 2, kind: input, shape index: {}]   ;;  %s876_s3 = inlined_call_operand.vmem [shape: f32[96,32], index: 3, kind: input, shape index: {}]   ;;  %s877_s4 = inlined_call_operand.vmem [shape: f32[1,32], index: 4, kind: input, shape index: {}]   ;;  %s878_s5 = inlined_call_operand.vmem [shape: f32[8,8,96], index: 5, kind: input, shape index: {}]   ;;  %s879_s6 = inlined_call_operand.hbm [shape: f32[16,32], index: 6, kind: output, shape index: {}]  }
   0x1   :  { %12 = vsyncpa [#allocation6], 0 }
   0x2   :  { %13 = vsyncpa [#allocation4], 0  ;;  %s18_s23 = sshll.u32 %s873_s0, 4  ;;  %s570_s24 = smov [#allocation2]   ;;  %s19_s23 = int_to_ptr.hbm [resolvable:$true] %s18_s23 }
   0x3   :  { %s20_s25 = sshll.u32 %s570_s24, 4  ;;  %s34_s28 = sshll.u32 %s875_s2, 4  ;;  %s21_s25 = int_to_ptr.vmem [resolvable:$true] %s20_s25  ;;  %s35_s28 = int_to_ptr.hbm [resolvable:$true] %s34_s28 }
   0x4   :  { %s571_s29 = smov 128   ;;  %s572_s30 = smov 8  }
   0x5   :  { %26 = dma.hbm_to_vmem [thread:$0]  %s19_s23, 256, %s21_s25, [#allocation3], %s571_s29, %s571_s29, %s572_s30  }
   0x6   :  { %s573_s7 = smov [#allocation5]  }
   0x7   :  { %s36_s8 = sshll.u32 %s573_s7, 4  ;;  %s37_s8 = int_to_ptr.vmem [resolvable:$true] %s36_s8 }
   0x8   :  { %39 = dma.hbm_to_vmem [thread:$0]  %s35_s28, 32, %s37_s8, [#allocation6]  }
   0x9   :  { %564 = dma.done.wait [#allocation3], 256  }
   0xa   :  { %565 = vsyncadd [#allocation3], 4294967040 }
   0xb   :  { %566 = dma.done.wait [#allocation6], 32  }
   0xc   :  { %567 = vsyncadd [#allocation6], 4294967264  ;;  %v62_v0 = vld [vmem:[%s874_s1 + $0x30] sm:$0xff]  ;;  %v63_v1 = vld [vmem:[%s874_s1 + $0x38] sm:$0xff]  ;;  %vm70_vm0 = vcmask 261120   ;;  %vm227_vm9 = vcmask 785408  }
   0xd   :  { %v60_v2 = vld [vmem:[%s874_s1 + $0x20] sm:$0xff]  ;;  %89 = vmatpush.msra.mxu0 %v62_v0  ;;  %112 = vmatpush.msra.mxu1 %v63_v1  ;;  %v61_v3 = vld [vmem:[%s874_s1 + $0x28] sm:$0xff]  ;;  %v58_v4 = vld [vmem:[%s874_s1 + $0x10] sm:$0xff]  ;;  %vm356_vm14 = vcmask 1041409   ;;  %vm358_vm15 = vcmask 1042434   ;;  %s574_s13 = smov [#allocation7]  }
   0xe   :  { %v59_v5 = vld [vmem:[%s874_s1 + $0x18] sm:$0xff]  ;;  %v56_v6 = vld [vmem:[%s874_s1] sm:$0xff]  ;;  %v57_v7 = vld [vmem:[%s874_s1 + $0x8] sm:$0xff]  ;;  %s432_s14 = sshll.u32 %s574_s13, 4  ;;  %s434_s17 = sshll.u32 %s879_s6, 4  ;;  %s433_s14 = int_to_ptr.vmem [resolvable:$true] %s432_s14  ;;  %s435_s17 = int_to_ptr.hbm [resolvable:$true] %s434_s17 }
   0xf   :  { %90 = vmatpush.msra.mxu0 %v60_v2  ;;  %113 = vmatpush.msra.mxu1 %v61_v3  ;;  %v54_v8 = vld [vmem:[#allocation2] sm:$0xff]  ;;  %v55_v9 = vld [vmem:[#allocation2 + $0x8] sm:$0xff]  ;;  %v64_v10 = vld [vmem:[#allocation5] sm:$0x3] }
  0x10   :  { %v66_v11 = vperm.slane %v64_v10, 0  ;;  %v67_v12 = vperm.slane %v64_v10, 1  ;;  %v392_v19 = vld [vmem:[%s876_s3 + $0x58] sm:$0xff]  ;;  %v391_v20 = vld [vmem:[%s876_s3 + $0x50] sm:$0xff]  ;;  %v390_v25 = vld [vmem:[%s876_s3 + $0x48] sm:$0xff] }
  0x11   :  { %91 = vmatpush.msra.mxu0 %v58_v4  ;;  %114 = vmatpush.msra.mxu1 %v59_v5  ;;  %v389_v26 = vld [vmem:[%s876_s3 + $0x40] sm:$0xff]  ;;  %v388_v29 = vld [vmem:[%s876_s3 + $0x38] sm:$0xff]  ;;  %v387_v34 = vld [vmem:[%s876_s3 + $0x30] sm:$0xff] }
  0x12   :  { %407 = vmatpush.msra.mxu2 %v392_v19  ;;  %458 = vmatpush.msra.mxu3 %v392_v19  ;;  %v386_v35 = vld [vmem:[%s876_s3 + $0x28] sm:$0xff]  ;;  %v385_v36 = vld [vmem:[%s876_s3 + $0x20] sm:$0xff]  ;;  %v384_v38 = vld [vmem:[%s876_s3 + $0x18] sm:$0xff] }
  0x13   :  { %92 = vmatpush.msra.mxu0 %v56_v6  ;;  %115 = vmatpush.msra.mxu1 %v57_v7  ;;  %v383_v43 = vld [vmem:[%s876_s3 + $0x10] sm:$0xff]  ;;  %v382_v48 = vld [vmem:[%s876_s3 + $0x8] sm:$0xff]  ;;  %v381_v54 = vld [vmem:[%s876_s3] sm:$0xff] }
  0x14   :  { %448 = vmatmul.msk.f32.vlgmr.msra.gmra.mxu0 %vm70_vm0, %v54_v8  ;;  %450 = vmatmul.msk.f32.vlgmr.msra.gmra.mxu1 %vm70_vm0, %v54_v8  ;;  %v733_v10 = vld [vmem:[%s878_s5 + $0x8] sm:$0xff]  ;;  %v753_v19 = vld [vmem:[%s878_s5 + $0x20] sm:$0xff] }
  0x15   :  { %408 = vmatpush.msra.mxu2 %v391_v20  ;;  %459 = vmatpush.msra.mxu3 %v391_v20 }
  0x17   :  { %409 = vmatpush.msra.mxu2 %v390_v25  ;;  %460 = vmatpush.msra.mxu3 %v390_v25  ;;  %v766_v25 = vld [vmem:[%s878_s5 + $0x28] sm:$0xff] }
  0x19   :  { %410 = vmatpush.msra.mxu2 %v389_v26  ;;  %461 = vmatpush.msra.mxu3 %v389_v26 }
  0x1b   :  { %411 = vmatpush.msra.mxu2 %v388_v29  ;;  %462 = vmatpush.msra.mxu3 %v388_v29 }
  0x1c   :  { %449 = vmatmul.msk.f32.gmra.mxu0 %vm70_vm0, %v55_v9  ;;  %451 = vmatmul.msk.f32.gmra.mxu1 %vm70_vm0, %v55_v9  ;;  %v728_v9 = vld [vmem:[%s878_s5] sm:$0xff] }
  0x1d   :  { %412 = vmatpush.msra.mxu2 %v387_v34  ;;  %463 = vmatpush.msra.mxu3 %v387_v34 }
  0x1f   :  { %413 = vmatpush.msra.mxu2 %v386_v35  ;;  %464 = vmatpush.msra.mxu3 %v386_v35 }
  0x21   :  { %414 = vmatpush.msra.mxu2 %v385_v36  ;;  %465 = vmatpush.msra.mxu3 %v385_v36 }
  0x23   :  { %415 = vmatpush.msra.mxu2 %v384_v38  ;;  %466 = vmatpush.msra.mxu3 %v384_v38 }
  0x25   :  { %416 = vmatpush.msra.mxu2 %v383_v43  ;;  %467 = vmatpush.msra.mxu3 %v383_v43 }
  0x27   :  { %417 = vmatpush.msra.mxu2 %v382_v48  ;;  %468 = vmatpush.msra.mxu3 %v382_v48 }
  0x29   :  { %418 = vmatpush.msra.mxu2 %v381_v54  ;;  %469 = vmatpush.msra.mxu3 %v381_v54 }
  0x91   :  { %v94_v13 = vpop.f32.mrf.mxu0  ;;  %v117_v14 = vpop.f32.mrf.mxu1 }
  0x92   :  { %v647_v15 = vadd.f32 %v94_v13, %v66_v11  ;;  %v649_v16 = vadd.f32 %v117_v14, %v67_v12 }
  0x94   :  { %v452_v17 = vmul.f32 -1.442695, %v647_v15  ;;  %v453_v18 = vmul.f32 -1.442695, %v649_v16 }
  0x96   :  { %476 = vpow2.f32 %v452_v17 }
  0x97   :  { %478 = vpow2.f32 %v453_v18  ;;  %v748_v18 = vld [vmem:[%s878_s5 + $0x18] sm:$0xff] }
  0x99   :  { %v97_v21 = vpop.f32.mrf.mxu0  ;;  %v120_v22 = vpop.f32.mrf.mxu1 }
  0x9a   :  { %v659_v23 = vadd.f32 %v97_v21, %v66_v11  ;;  %v661_v24 = vadd.f32 %v120_v22, %v67_v12  ;;  %v738_v11 = vld [vmem:[%s878_s5 + $0x10] sm:$0xff] }
  0x9c   :  { %v477_v27 = vpop.eup %476  ;;  %v454_v28 = vmul.f32 -1.442695, %v659_v23  ;;  %v455_v32 = vmul.f32 -1.442695, %v661_v24 }
  0x9d   :  { %v479_v30 = vpop.eup %478  ;;  %v135_v31 = vadd.f32 1.0, %v477_v27 }
  0x9e   :  { %v674_v33 = vadd.f32 1.0, %v479_v30  ;;  %480 = vpow2.f32 %v454_v28 }
  0x9f   :  { %482 = vrcp.f32 %v135_v31  ;;  %vm144_vm1 = vweird.f32 %v135_v31  ;;  %v148_v49 = vand.u32 2147483647, %v135_v31  ;;  %v150_v50 = vand.u32 2147483648, %v135_v31 }
  0xa0   :  { %484 = vrcp.f32 %v674_v33  ;;  %v165_v52 = vand.u32 2147483648, %v674_v33  ;;  %v163_v57 = vand.u32 2147483647, %v674_v33  ;;  %vm159_vm5 = vweird.f32 %v674_v33 }
  0xa1   :  { %486 = vpow2.f32 %v455_v32  ;;  %vm714_vm6 = vcmp.eq.f32.partialorder %v148_v49, 8.507059e+37  ;;  %v151_v61 = vor.u32 1.1754944e-38, %v150_v50 }
  0xa2   :  { %v166_v63 = vor.u32 1.1754944e-38, %v165_v52  ;;  %vm164_vm8 = vcmp.eq.f32.partialorder %v163_v57, 8.507059e+37 }
  0xa4   :  { %v481_v37 = vpop.eup %480 }
  0xa5   :  { %v483_v39 = vpop.eup %482  ;;  %v689_v40 = vadd.f32 1.0, %v481_v37 }
  0xa6   :  { %v485_v41 = vpop.eup %484  ;;  %v140_v42 = vmul.f32 %v483_v39, %v135_v31  ;;  %vm145_vm2 = vweird.f32 %v483_v39  ;;  %v777_v31 = vld [vmem:[%s878_s5 + $0x30] sm:$0xff] }
  0xa7   :  { %v487_v44 = vpop.eup %486  ;;  %v155_v45 = vmul.f32 %v485_v41, %v674_v33  ;;  %488 = vrcp.f32 %v689_v40  ;;  %vm706_vm3 = vmor %vm144_vm1, %vm145_vm2  ;;  %vm160_vm4 = vweird.f32 %v485_v41  ;;  %v180_v2 = vand.u32 2147483648, %v689_v40 }
  0xa8   :  { %v141_v46 = vsub.f32 1.0, %v140_v42  ;;  %v696_v47 = vadd.f32 1.0, %v487_v44  ;;  %vm161_vm7 = vmor %vm159_vm5, %vm160_vm4  ;;  %v178_v14 = vand.u32 2147483647, %v689_v40  ;;  %vm360_vm1 = vcmask 1043459  }
  0xa9   :  { %v156_v51 = vsub.f32 1.0, %v155_v45  ;;  %v756_v21 = vor.u32 1.1754944e-38, %v180_v2  ;;  %vm362_vm2 = vcmask 1044484   ;;  %vm366_vm4 = vcmask 1046534  }
  0xaa   :  { %v142_v53 = vmul.f32 %v483_v39, %v141_v46  ;;  %490 = vrcp.f32 %v696_v47  ;;  %v193_v3 = vand.u32 2147483647, %v696_v47  ;;  %v195_v8 = vand.u32 2147483648, %v696_v47 }
  0xab   :  { %v157_v56 = vmul.f32 %v485_v41, %v156_v51  ;;  %vm189_vm10 = vweird.f32 %v696_v47  ;;  %vm368_vm5 = vcmask 1047559  }
  0xac   :  { %v143_v58 = vadd.f32 %v483_v39, %v142_v53  ;;  %vm759_vm11 = vcmp.eq.f32.partialorder %v193_v3, 8.507059e+37  ;;  %v196_v30 = vor.u32 1.1754944e-38, %v195_v8 }
  0xad   :  { %v712_v59 = vpop.eup %488  ;;  %v158_v62 = vadd.f32 %v485_v41, %v157_v56 }
  0xae   :  { %v147_v0 = vsel %vm706_vm3, %v483_v39, %v143_v58  ;;  %v170_v1 = vmul.f32 %v712_v59, %v689_v40  ;;  %vm364_vm3 = vcmask 1045509  }
  0xaf   :  { %v162_v4 = vsel %vm161_vm7, %v485_v41, %v158_v62  ;;  %v152_v12 = vsel %vm714_vm6, %v151_v61, %v147_v0  ;;  %vm174_vm6 = vweird.f32 %v689_v40  ;;  %vm175_vm7 = vweird.f32 %v712_v59 }
  0xb0   :  { %v491_v5 = vpop.eup %490  ;;  %v167_v6 = vsel %vm164_vm8, %v166_v63, %v162_v4  ;;  %v171_v7 = vsub.f32 1.0, %v170_v1  ;;  %v772_v29 = vmul.f32 %v152_v12, %v647_v15  ;;  %v787_v15 = vld [vmem:[%s878_s5 + $0x38] sm:$0xff]  ;;  %vm832_vm8 = vcmp.eq.f32.partialorder %v178_v14, 8.507059e+37 }
  0xb1   :  { %v200_v13 = vmul.f32 %v167_v6, %v649_v16  ;;  %v185_v17 = vmul.f32 %v491_v5, %v696_v47  ;;  %vm190_vm12 = vweird.f32 %v491_v5 }
  0xb2   :  { %v172_v20 = vmul.f32 %v712_v59, %v171_v7  ;;  %vm191_vm13 = vmor %vm189_vm10, %vm190_vm12 }
  0xb3   :  { %v186_v22 = vsub.f32 1.0, %v185_v17  ;;  %v211_v26 = vmul.f32 %v728_v9, %v200_v13  ;;  %v212_v27 = vmul.f32 %v733_v10, %v200_v13  ;;  %v213_v28 = vmul.f32 %v738_v11, %v200_v13  ;;  %vm842_vm10 = vmor %vm174_vm6, %vm175_vm7 }
  0xb4   :  { %v214_v32 = vmul.f32 %v748_v18, %v200_v13  ;;  %v215_v33 = vmul.f32 %v753_v19, %v200_v13  ;;  %v782_v34 = vadd.f32 %v712_v59, %v172_v20  ;;  %v216_v37 = vmul.f32 %v766_v25, %v200_v13 }
  0xb5   :  { %v187_v35 = vmul.f32 %v491_v5, %v186_v22  ;;  %v228_v36 = vsel %vm227_vm9, %v211_v26, 0.0  ;;  %v235_v39 = vsel %vm227_vm9, %v212_v27, 0.0  ;;  %v242_v41 = vsel %vm227_vm9, %v213_v28, 0.0 }
  0xb6   :  { %v229_v38 = vrot.slane %v228_v36, 4  ;;  %v217_v43 = vmul.f32 %v777_v31, %v200_v13  ;;  %v236_v44 = vrot.slane %v235_v39, 4  ;;  %v243_v45 = vrot.slane %v242_v41, 4 }
  0xb7   :  { %v188_v42 = vadd.f32 %v491_v5, %v187_v35  ;;  %v218_v46 = vmul.f32 %v787_v15, %v200_v13  ;;  %v249_v49 = vsel %vm227_vm9, %v214_v32, 0.0  ;;  %v256_v50 = vsel %vm227_vm9, %v215_v33, 0.0 }
  0xb8   :  { %v230_v48 = vadd.f32 %v229_v38, %v228_v36  ;;  %v237_v52 = vadd.f32 %v236_v44, %v235_v39  ;;  %v244_v53 = vadd.f32 %v243_v45, %v242_v41  ;;  %v250_v54 = vrot.slane %v249_v49, 4 }
  0xb9   :  { %v192_v51 = vsel %vm191_vm13, %v491_v5, %v188_v42  ;;  %v257_v57 = vrot.slane %v256_v50, 4  ;;  %v263_v47 = vsel %vm227_vm9, %v216_v37, 0.0  ;;  %v270_v2 = vsel %vm227_vm9, %v217_v43, 0.0 }
  0xba   :  { %v197_v55 = vsel %vm759_vm11, %v196_v30, %v192_v51  ;;  %v231_v56 = vrot.slane %v230_v48, 2  ;;  %v238_v60 = vrot.slane %v237_v52, 2  ;;  %v245_v61 = vrot.slane %v244_v53, 2 }
  0xbb   :  { %v202_v58 = vmul.f32 %v197_v55, %v661_v24  ;;  %v251_v62 = vadd.f32 %v250_v54, %v249_v49  ;;  %v258_v0 = vadd.f32 %v257_v57, %v256_v50  ;;  %v264_v1 = vrot.slane %v263_v47, 4 }
  0xbc   :  { %v232_v63 = vadd.f32 %v231_v56, %v230_v48  ;;  %v239_v3 = vadd.f32 %v238_v60, %v237_v52  ;;  %v246_v4 = vadd.f32 %v245_v61, %v244_v53  ;;  %v271_v6 = vrot.slane %v270_v2, 4 }
  0xbd   :  { %v252_v5 = vrot.slane %v251_v62, 2  ;;  %v259_v8 = vrot.slane %v258_v0, 2  ;;  %v265_v12 = vadd.f32 %v264_v1, %v263_v47  ;;  %v277_v13 = vsel %vm227_vm9, %v218_v46, 0.0 }
  0xbe   :  { %v233_v7 = vrot.slane %v232_v63, 1  ;;  %v240_v24 = vrot.slane %v239_v3, 1  ;;  %v247_v17 = vrot.slane %v246_v4, 1  ;;  %v272_v16 = vadd.f32 %v271_v6, %v270_v2 }
  0xbf   :  { %v253_v20 = vadd.f32 %v252_v5, %v251_v62  ;;  %v260_v26 = vadd.f32 %v259_v8, %v258_v0  ;;  %v266_v27 = vrot.slane %v265_v12, 2  ;;  %v278_v28 = vrot.slane %v277_v13, 4 }
  0xc0   :  { %v234_v22 = vadd.f32 %v233_v7, %v232_v63  ;;  %v241_v30 = vadd.f32 %v240_v24, %v239_v3  ;;  %v248_v32 = vadd.f32 %v247_v17, %v246_v4  ;;  %v273_v35 = vrot.slane %v272_v16, 2 }
  0xc1   :  { %v254_v33 = vrot.slane %v253_v20, 1  ;;  %v261_v36 = vrot.slane %v260_v26, 1  ;;  %v267_v37 = vadd.f32 %v266_v27, %v265_v12  ;;  %v279_v38 = vadd.f32 %v278_v28, %v277_v13 }
  0xc2   :  { %v219_v39 = vmul.f32 %v728_v9, %v202_v58  ;;  %v274_v42 = vadd.f32 %v273_v35, %v272_v16  ;;  %v357_v43 = vsel %vm356_vm14, %v241_v30, %v234_v22  ;;  %v220_v44 = vmul.f32 %v733_v10, %v202_v58 }
  0xc3   :  { %v255_v41 = vadd.f32 %v254_v33, %v253_v20  ;;  %v262_v45 = vadd.f32 %v261_v36, %v260_v26  ;;  %v268_v46 = vrot.slane %v267_v37, 1  ;;  %v280_v48 = vrot.slane %v279_v38, 2 }
  0xc4   :  { %v359_v49 = vsel %vm358_vm15, %v248_v32, %v357_v43  ;;  %v275_v50 = vrot.slane %v274_v42, 1  ;;  %v221_v52 = vmul.f32 %v738_v11, %v202_v58  ;;  %v222_v53 = vmul.f32 %v748_v18, %v202_v58 }
  0xc5   :  { %v361_v51 = vsel %vm360_vm1, %v255_v41, %v359_v49  ;;  %v269_v54 = vadd.f32 %v268_v46, %v267_v37  ;;  %v281_v9 = vadd.f32 %v280_v48, %v279_v38  ;;  %v223_v56 = vmul.f32 %v753_v19, %v202_v58 }
  0xc6   :  { %v363_v55 = vsel %vm362_vm2, %v262_v45, %v361_v51  ;;  %v276_v10 = vadd.f32 %v275_v50, %v274_v42  ;;  %v224_v57 = vmul.f32 %v766_v25, %v202_v58  ;;  %v225_v47 = vmul.f32 %v777_v31, %v202_v58 }
  0xc7   :  { %v226_v60 = vmul.f32 %v787_v15, %v202_v58  ;;  %v282_v11 = vrot.slane %v281_v9, 1  ;;  %v365_v18 = vsel %vm364_vm3, %v269_v54, %v363_v55  ;;  %v284_v61 = vsel %vm227_vm9, %v219_v39, 0.0 }
  0xc8   :  { %v291_v62 = vsel %vm227_vm9, %v220_v44, 0.0  ;;  %v367_v19 = vsel %vm366_vm4, %v276_v10, %v365_v18  ;;  %v285_v63 = vrot.slane %v284_v61, 4  ;;  %v298_v1 = vsel %vm227_vm9, %v221_v52, 0.0 }
  0xc9   :  { %v292_v0 = vrot.slane %v291_v62, 4  ;;  %v283_v2 = vadd.f32 %v282_v11, %v281_v9  ;;  %v299_v3 = vrot.slane %v298_v1, 4  ;;  %v305_v25 = vsel %vm227_vm9, %v222_v53, 0.0 }
  0xca   :  { %v312_v31 = vsel %vm227_vm9, %v223_v56, 0.0  ;;  %v286_v15 = vadd.f32 %v285_v63, %v284_v61  ;;  %v306_v4 = vrot.slane %v305_v25, 4  ;;  %v319_v8 = vsel %vm227_vm9, %v224_v57, 0.0 }
  0xcb   :  { %v293_v58 = vadd.f32 %v292_v0, %v291_v62  ;;  %v313_v5 = vrot.slane %v312_v31, 4  ;;  %v369_v6 = vsel %vm368_vm5, %v283_v2, %v367_v19  ;;  %v300_v7 = vadd.f32 %v299_v3, %v298_v1 }
  0xcc   :  { %v326_v12 = vsel %vm227_vm9, %v225_v47, 0.0  ;;  %v379_v13 = vmul.f32 %v369_v6, %v772_v29  ;;  %v287_v24 = vrot.slane %v286_v15, 2  ;;  %v307_v20 = vadd.f32 %v306_v4, %v305_v25 }
  0xcd   :  { %v294_v17 = vrot.slane %v293_v58, 2  ;;  %v301_v22 = vrot.slane %v300_v7, 2  ;;  %v314_v26 = vadd.f32 %v313_v5, %v312_v31  ;;  %v320_v27 = vrot.slane %v319_v8, 4 }
  0xce   :  { %v327_v28 = vrot.slane %v326_v12, 4  ;;  %456 = vmatmul.msk.f32.vlgmr.msra.gmra.mxu2 %vm227_vm9, %v379_v13  ;;  %v288_v30 = vadd.f32 %v287_v24, %v286_v15  ;;  %v308_v33 = vrot.slane %v307_v20, 2  ;;  %v333_v29 = vsel %vm227_vm9, %v226_v60, 0.0 }
  0xcf   :  { %v295_v32 = vadd.f32 %v294_v17, %v293_v58  ;;  %v302_v35 = vadd.f32 %v301_v22, %v300_v7  ;;  %v315_v36 = vrot.slane %v314_v26, 2  ;;  %v321_v37 = vadd.f32 %v320_v27, %v319_v8  ;;  %v475_v58 = vld [vmem:[%s877_s4] ss:$0 sm:$0xff] }
  0xd0   :  { %v328_v38 = vadd.f32 %v327_v28, %v326_v12  ;;  %v289_v39 = vrot.slane %v288_v30, 1  ;;  %v309_v41 = vadd.f32 %v308_v33, %v307_v20  ;;  %v334_v42 = vrot.slane %v333_v29, 4 }
  0xd1   :  { %v296_v14 = vrot.slane %v295_v32, 1  ;;  %v303_v44 = vrot.slane %v302_v35, 1  ;;  %v316_v45 = vadd.f32 %v315_v36, %v314_v26  ;;  %v322_v46 = vrot.slane %v321_v37, 2 }
  0xd2   :  { %v329_v48 = vrot.slane %v328_v38, 2  ;;  %v290_v49 = vadd.f32 %v289_v39, %v288_v30  ;;  %v310_v51 = vrot.slane %v309_v41, 1  ;;  %v335_v52 = vadd.f32 %v334_v42, %v333_v29 }
  0xd3   :  { %v297_v50 = vadd.f32 %v296_v14, %v295_v32  ;;  %v304_v53 = vadd.f32 %v303_v44, %v302_v35  ;;  %v317_v54 = vrot.slane %v316_v45, 1  ;;  %v323_v9 = vadd.f32 %v322_v46, %v321_v37 }
  0xd4   :  { %v330_v55 = vadd.f32 %v329_v48, %v328_v38  ;;  %v177_v40 = vsel %vm842_vm10, %v712_v59, %v782_v34  ;;  %v311_v56 = vadd.f32 %v310_v51, %v309_v41  ;;  %v336_v10 = vrot.slane %v335_v52, 2 }
  0xd5   :  { %v370_v57 = vsel %vm356_vm14, %v297_v50, %v290_v49  ;;  %v318_v47 = vadd.f32 %v317_v54, %v316_v45  ;;  %v324_v60 = vrot.slane %v323_v9, 1  ;;  %v182_v0 = vsel %vm832_vm8, %v756_v21, %v177_v40 }
  0xd6   :  { %v331_v11 = vrot.slane %v330_v55, 1  ;;  %v371_v18 = vsel %vm358_vm15, %v304_v53, %v370_v57  ;;  %v337_v61 = vadd.f32 %v336_v10, %v335_v52  ;;  %v201_v25 = vmul.f32 %v182_v0, %v659_v23 }
  0xd7   :  { %v372_v62 = vsel %vm360_vm1, %v311_v56, %v371_v18  ;;  %v325_v19 = vadd.f32 %v324_v60, %v323_v9 }
  0xd8   :  { %v373_v63 = vsel %vm362_vm2, %v318_v47, %v372_v62  ;;  %v332_v59 = vadd.f32 %v331_v11, %v330_v55  ;;  %v338_v34 = vrot.slane %v337_v61, 1 }
  0xd9   :  { %v374_v1 = vsel %vm364_vm3, %v325_v19, %v373_v63 }
  0xda   :  { %v339_v2 = vadd.f32 %v338_v34, %v337_v61  ;;  %v375_v3 = vsel %vm366_vm4, %v332_v59, %v374_v1 }
  0xdc   :  { %v376_v31 = vsel %vm368_vm5, %v339_v2, %v375_v3 }
  0xdd   :  { %v380_v15 = vmul.f32 %v376_v31, %v201_v25 }
  0xdf   :  { %457 = vmatmul.msk.f32.vlgmr.msra.gmra.mxu3 %vm227_vm9, %v380_v15 }
 0x151   :  { %v420_v4 = vpop.f32.mrf.mxu2 }
 0x152   :  { %v421_v21 = vadd.f32 %v475_v58, %v420_v4 }
 0x154   :  { %426 = vst.msk [vmem:[#allocation7] sm:$0xff] %vm70_vm0, %v421_v21 }
 0x162   :  { %v423_v23 = vpop.f32.mrf.mxu3 }
 0x163   :  { %v424_v5 = vadd.f32 %v475_v58, %v423_v23 }
 0x165   :  { %427 = vst.msk [vmem:[#allocation7 + $0x8] sm:$0xff] %vm70_vm0, %v424_v5 }
 0x166   :  { %440 = dma.vmem_to_hbm [thread:$0]  %s433_s14, 256, %s435_s17, [#allocation4], %s571_s29, %s571_s29, %s572_s30  }
 0x167   :  { %568 = dma.done.wait [#allocation4], 256  }
 0x168   :  { %569 = vsyncadd [#allocation4], 4294967040 }
 0x169   :  { %445 = vsyncpa [#allocation3], 1 }
 0x16a   :  { %446 = vsyncpa [#allocation6], 1 }
 0x16b   :  { %447 = vsyncpa [#allocation4], 1 }

</bundles_post_ra>
